<compile_context>
chip_gen: v5e
topology: v5e:2x2
jax: 0.10.0
libtpu: 0.0.40
codegen_flags: <defaults>
</compile_context>

<pallas_src>
import functools

import jax
import jax.numpy as jnp
from jax import lax
from jax.experimental import pallas as pl
from jax.experimental.pallas import tpu as pltpu


def _round_up(x, m):
    return ((x + m - 1) // m) * m


def _cdiv(a, b):
    return (a + b - 1) // b


# ------------------------------------------------------------------------------ kernel
def _mlp_deep_residual_kernel(
    x_ref,        # (TILE_B, TILE_K)   f32 or bf16  (K-streamed)
    w_in_ref,     # (TILE_K, H)        bf16         (K-streamed)
    b_in_ref,     # (1, H)             f32          (resident)
    w_res_ref,    # (L, H, H)          bf16         (resident)
    b_res_ref,    # (L, 1, H)          f32          (resident)
    w_out_ref,    # (H, C_PAD)         bf16         (resident)
    b_out_ref,    # (1, C_PAD)         f32          (resident)
    o_ref,        # (TILE_B, C_PAD)    f32
    acc_ref,      # (TILE_B, H)        f32 VMEM scratch: fc_in accumulator
    *,
    epi_rows,     # static row-chunk size for the last-K epilogue
):
    k = pl.program_id(1)
    nk = pl.num_programs(1)

    # fc_in: K-tiled MXU accumulation (bf16 x bf16 -> f32).  x is cast in-kernel so the
    # wrapper never materializes a bf16 copy of the input in HBM.
    @pl.when(k == 0)
    def _():
        acc_ref[...] = jnp.zeros_like(acc_ref)

    acc_ref[...] += jnp.dot(
        x_ref[...].astype(jnp.bfloat16), w_in_ref[...],
        preferred_element_type=jnp.float32,
    )

    # Residual blocks + fc_out once the contraction over D_in is complete.  Processed in
    # <=256-row chunks of the accumulator to bound vreg pressure at large TILE_B.
    @pl.when(k == nk - 1)
    def _():
        num_layers = w_res_ref.shape[0]
        n_chunks = acc_ref.shape[0] // epi_rows

        def chunk(c, carry):
            r0 = c * epi_rows
            if not isinstance(r0, int):
                r0 = pl.multiple_of(r0, epi_rows)
            rows = pl.ds(r0, epi_rows)
            h = jnp.maximum(acc_ref[rows, :] + b_in_ref[...], 0.0)      # f32 bias + ReLU
            for l in range(num_layers):                                  # L is small: static unroll
                y = jnp.dot(h.astype(jnp.bfloat16), w_res_ref[l],
                            preferred_element_type=jnp.float32)
                h = jnp.maximum(y + b_res_ref[l] + h, 0.0)               # relu(block(x) + x)
            logits = jnp.dot(h.astype(jnp.bfloat16), w_out_ref[...],
                             preferred_element_type=jnp.float32)
            o_ref[rows, :] = logits + b_out_ref[...]                     # lane-dense padded slab
            return carry

        if n_chunks == 1:
            chunk(0, 0)
        else:
            lax.fori_loop(0, n_chunks, chunk, 0)


# --------------------------------------------------------------- device-aware settings
def _device_kind():
    try:
        return jax.devices()[0].device_kind.lower()
    except Exception:
        return ""


def _num_tensorcores(kind):
    # v7x packs 2 TensorCores per chip; v5e/v6e expose 1.
    return 2 if "v7" in kind else 1


def _vmem_limit_bytes(kind):
    if "v7" in kind:
        return 48 * 1024 * 1024          # of 64 MiB/TC physical
    if "v6" in kind or "v5e" in kind or "v5 lite" in kind or "v5litepod" in kind:
        return 96 * 1024 * 1024          # of 128 MiB physical
    return 64 * 1024 * 1024


# ---------------------------------------------------------------- plan / weight prep
def make_plan(d_in, hidden_dim, num_classes, num_layers, *, tile_k_cap=2048):
    """Static tiling plan; fixes the padded weight shapes used by prepare_params."""
    tile_k = min(tile_k_cap, _round_up(d_in, 128))    # multiple of 128
    d_pad = _round_up(d_in, tile_k)                   # pad D to a tile_k multiple
    c_pad = _round_up(num_classes, 128)               # lane-dense output slab
    return dict(d_in=d_in, hidden_dim=hidden_dim, num_classes=num_classes,
                num_layers=num_layers, tile_k=tile_k, d_pad=d_pad, c_pad=c_pad)


def prepare_params(params, plan):
    """One-time pad + bf16 cast of the weights — keep this OUT of the per-call path."""
    w_in, b_in, w_res, b_res, w_out, b_out = params
    d_in, d_pad = plan["d_in"], plan["d_pad"]
    hdim, ncls, c_pad = plan["hidden_dim"], plan["num_classes"], plan["c_pad"]
    nlayers = plan["num_layers"]
    return dict(
        plan=plan,
        w_in=jnp.pad(w_in, ((0, d_pad - d_in), (0, 0))).astype(jnp.bfloat16),
        b_in=b_in.reshape(1, hdim).astype(jnp.float32),
        w_res=w_res.astype(jnp.bfloat16),
        b_res=b_res.reshape(nlayers, 1, hdim).astype(jnp.float32),
        w_out=jnp.pad(w_out, ((0, 0), (0, c_pad - ncls))).astype(jnp.bfloat16),
        b_out=jnp.pad(b_out.reshape(1, ncls),
                      ((0, 0), (0, c_pad - ncls))).astype(jnp.float32),
    )


# -------------------------------------------------------------------------- forward
def mlp_classifier_deep_residual(x, prepared, *, tile_b_cap=512):
    """x: (b, 3, H, W) f32 image.  Returns (b, num_classes) f32 logits."""
    plan = prepared["plan"]
    d_in, d_pad, tile_k = plan["d_in"], plan["d_pad"], plan["tile_k"]
    hdim, c_pad, ncls = plan["hidden_dim"], plan["c_pad"], plan["num_classes"]
    nlayers = plan["num_layers"]

    b = x.shape[0]
    x_flat = x.reshape(b, -1)                          # same element order as torch .view
    assert x_flat.shape[1] == d_in, "input spatial size does not match the plan"

    kind = _device_kind()
    n_tc = _num_tensorcores(kind)
    vmem_limit = _vmem_limit_bytes(kind)

    # ---- batch tiling: multiples of 16 (bf16 sublane packing); >= n_tc tiles on v7x ----
    b16 = _round_up(b, 16)
    tile_b = min(tile_b_cap, b16)
    if n_tc > 1 and b16 >= 16 * n_tc:
        tile_b = min(tile_b, _round_up(_cdiv(b16, n_tc), 16))

    # Shrink tile_b if the estimated VMEM working set would exceed the scoped limit.
    def vmem_estimate(tb):
        return (3 * tb * tile_k * 4                    # x blocks (worst case f32, 3 buffers)
                + 3 * tile_k * hdim * 2                # w_in blocks (bf16, 3 buffers)
                + nlayers * hdim * hdim * 2            # resident w_res (single-buffered)
                + nlayers * hdim * 4 + hdim * 4        # resident biases
                + hdim * c_pad * 2 + c_pad * 4         # resident fc_out
                + tb * hdim * 4                        # accumulator scratch
                + 2 * tb * c_pad * 4)                  # output blocks
    while vmem_estimate(tile_b) > vmem_limit - (2 << 20) and tile_b > 64:
        tile_b = max(64, _round_up(tile_b // 2, 16))

    b_pad = _round_up(b, tile_b)

    # Epilogue row-chunking keeps the residual chain's live f32 values small.
    epi_rows = tile_b
    if epi_rows > 256:
        epi_rows = 256
        while tile_b % epi_rows:
            epi_rows -= 16

    # ---- input: avoid an extra HBM pad+cast pass over x unless padding is unavoidable ----
    if b_pad == b and d_pad == d_in:
        x_in = x_flat                                  # f32 straight from HBM; cast in-kernel
    else:
        x_in = jnp.pad(x_flat, ((0, b_pad - b), (0, d_pad - d_in))).astype(jnp.bfloat16)

    grid = (b_pad // tile_b, d_pad // tile_k)          # (batch "parallel", K "arbitrary")
    n_btiles = grid[0]

    flops = 2 * b_pad * (d_pad * hdim + nlayers * hdim * hdim + hdim * c_pad)
    bytes_accessed = (
        x_in.size * x_in.dtype.itemsize
        + prepared["w_in"].size * 2 * n_btiles         # w_in is re-streamed per batch tile
        + prepared["w_res"].size * 2 + prepared["w_out"].size * 2
        + (prepared["b_in"].size + prepared["b_res"].size + prepared["b_out"].size) * 4
        + b_pad * c_pad * 4)

    kernel = functools.partial(_mlp_deep_residual_kernel, epi_rows=epi_rows)

    # TODO(synk): when num_layers*hidden_dim^2*2B approaches ~1/4 of VMEM (v7x: 64 MiB/TC),
    # stream w_res/b_res per layer (extra "arbitrary" grid axis or pltpu.emit_pipeline)
    # instead of keeping the whole (L, H, H) slab resident.
    def build_in_specs(use_pipeline_mode):
        def spec(shape, imap, buffers):
            if use_pipeline_mode and buffers is not None:
                return pl.BlockSpec(shape, imap, pipeline_mode=pl.Buffered(buffers))
            return pl.BlockSpec(shape, imap)
        return [
            spec((tile_b, tile_k), lambda i, k: (i, k), 3),           # x (K-streamed)
            spec((tile_k, hdim), lambda i, k: (k, 0), 3),             # w_in (K-streamed)
            spec((1, hdim), lambda i, k: (0, 0), 1),                  # b_in (resident)
            spec((nlayers, hdim, hdim), lambda i, k: (0, 0, 0), 1),   # w_res (resident)
            spec((nlayers, 1, hdim), lambda i, k: (0, 0, 0), 1),      # b_res (resident)
            spec((hdim, c_pad), lambda i, k: (0, 0), 1),              # w_out (resident)
            spec((1, c_pad), lambda i, k: (0, 0), 1),                 # b_out (resident)
        ]

    def run(use_pipeline_mode):
        return pl.pallas_call(
            kernel,
            out_shape=jax.ShapeDtypeStruct((b_pad, c_pad), jnp.float32),
            grid_spec=pltpu.PrefetchScalarGridSpec(
                num_scalar_prefetch=0,
                grid=grid,
                in_specs=build_in_specs(use_pipeline_mode),
                out_specs=pl.BlockSpec((tile_b, c_pad), lambda i, k: (i, 0)),
                scratch_shapes=[pltpu.VMEM((tile_b, hdim), jnp.float32)],
            ),
            compiler_params=pltpu.CompilerParams(
                dimension_semantics=("parallel", "arbitrary"),
                vmem_limit_bytes=int(vmem_limit),
            ),
            cost_estimate=pl.CostEstimate(
                flops=int(flops), transcendentals=0,
                bytes_accessed=int(bytes_accessed)),
        )(x_in, prepared["w_in"], prepared["b_in"], prepared["w_res"],
          prepared["b_res"], prepared["w_out"], prepared["b_out"])

    try:
        out = run(True)
    except Exception:
        # pipeline_mode / pl.Buffered unavailable (or rejected) on this jax version:
        # fall back to default double-buffering — numerics are identical.
        out = run(False)

    return out[:b, :ncls]


# ---------------------------------------------------------------------- init / reference
def init_params(key, h, w, num_classes, hidden_dim, num_layers):
    """Torch-like (f32) parameters; weights stored (in_features, out_features)."""
    d_in = 3 * h * w
    ks = jax.random.split(key, 6)
    s_in = 1.0 / jnp.sqrt(d_in)
    s_h = 1.0 / jnp.sqrt(hidden_dim)
    w_in = jax.random.uniform(ks[0], (d_in, hidden_dim), jnp.float32, -s_in, s_in)
    b_in = jax.random.uniform(ks[1], (1, hidden_dim), jnp.float32, -s_in, s_in)
    w_res = jax.random.uniform(ks[2], (num_layers, hidden_dim, hidden_dim),
                               jnp.float32, -s_h, s_h)
    b_res = jax.random.uniform(ks[3], (num_layers, 1, hidden_dim),
                               jnp.float32, -s_h, s_h)
    w_out = jax.random.uniform(ks[4], (hidden_dim, num_classes), jnp.float32, -s_h, s_h)
    b_out = jax.random.uniform(ks[5], (1, num_classes), jnp.float32, -s_h, s_h)
    return (w_in, b_in, w_res, b_res, w_out, b_out)


def _reference_bf16(x, params):
    """Pure-JAX reference using the same bf16-operand / f32-accumulate precision."""
    w_in, b_in, w_res, b_res, w_out, b_out = params
    h = x.reshape(x.shape[0], -1)
    h = jnp.dot(h.astype(jnp.bfloat16), w_in.astype(jnp.bfloat16),
                preferred_element_type=jnp.float32)
    h = jnp.maximum(h + b_in, 0.0)
    for l in range(w_res.shape[0]):
        y = jnp.dot(h.astype(jnp.bfloat16), w_res[l].astype(jnp.bfloat16),
                    preferred_element_type=jnp.float32)
        h = jnp.maximum(y + b_res[l] + h, 0.0)
    return jnp.dot(h.astype(jnp.bfloat16), w_out.astype(jnp.bfloat16),
                   preferred_element_type=jnp.float32) + b_out


if __name__ == "__main__":
    # Small shapes consistent with the module's forward: (b, 3, H, W) image.
    B, H_IMG, W_IMG = 4, 16, 16
    NUM_CLASSES, HIDDEN_DIM, NUM_LAYERS = 6, 128, 3

    key = jax.random.PRNGKey(0)
    k_x, k_p = jax.random.split(key)

    x = jax.random.normal(k_x, (B, 3, H_IMG, W_IMG), jnp.float32)
    params = init_params(k_p, H_IMG, W_IMG, NUM_CLASSES, HIDDEN_DIM, NUM_LAYERS)

    plan = make_plan(3 * H_IMG * W_IMG, HIDDEN_DIM, NUM_CLASSES, NUM_LAYERS)
    prepared = prepare_params(params, plan)          # one-time bf16/pad of the weights

    logits = jax.block_until_ready(mlp_classifier_deep_residual(x, prepared))

    ref = _reference_bf16(x, params)
    assert logits.shape == (B, NUM_CLASSES)
    max_err = float(jnp.max(jnp.abs(logits - ref)))
    assert max_err < 2e-2, f"max abs err = {max_err}"

    print("KERNEL_OK")
</pallas_src>

<mosaic_0001>
module attributes {stable_mosaic.version = 11 : i64} {
  func.func @_mlp_deep_residual_kernel(%arg0: i32, %arg1: i32, %arg2: memref<16x768xbf16, #tpu.memory_space<vmem>>, %arg3: memref<768x128xbf16, #tpu.memory_space<vmem>>, %arg4: memref<1x128xf32, #tpu.memory_space<vmem>>, %arg5: memref<3x128x128xbf16, #tpu.memory_space<vmem>>, %arg6: memref<3x1x128xf32, #tpu.memory_space<vmem>>, %arg7: memref<128x128xbf16, #tpu.memory_space<vmem>>, %arg8: memref<1x128xf32, #tpu.memory_space<vmem>>, %arg9: memref<16x128xf32, #tpu.memory_space<vmem>>, %arg10: memref<16x128xf32, #tpu.memory_space<vmem>>) attributes {dimension_semantics = [#tpu.dimension_semantics<parallel>, #tpu.dimension_semantics<arbitrary>], iteration_bounds = array<i64: 1, 1>, scalar_prefetch = 0 : i64, scratch_operands = 1 : i64, tpu.core_type = #tpu.core_type<tc>, window_params = [{transform_indices = @transform_0, window_bounds = array<i64: 16, 768>}, {transform_indices = @transform_1, window_bounds = array<i64: 768, 128>}, {pipeline_mode = #tpu.pipeline_mode<synchronous>, transform_indices = @transform_2, window_bounds = array<i64: 1, 128>}, {pipeline_mode = #tpu.pipeline_mode<synchronous>, transform_indices = @transform_3, window_bounds = array<i64: 3, 128, 128>}, {pipeline_mode = #tpu.pipeline_mode<synchronous>, transform_indices = @transform_4, window_bounds = array<i64: 3, 1, 128>}, {pipeline_mode = #tpu.pipeline_mode<synchronous>, transform_indices = @transform_5, window_bounds = array<i64: 128, 128>}, {pipeline_mode = #tpu.pipeline_mode<synchronous>, transform_indices = @transform_6, window_bounds = array<i64: 1, 128>}, {transform_indices = @transform_7, window_bounds = array<i64: 16, 128>}]} {
    %c0_i32 = arith.constant 0 : i32
    %0 = arith.cmpi eq, %arg1, %c0_i32 : i32
    %1 = arith.extui %0 : i1 to i32
    %c0_i32_0 = arith.constant 0 : i32
    %2 = arith.cmpi ne, %1, %c0_i32_0 : i32
    scf.if %2 {
      %cst_10 = arith.constant 0.000000e+00 : f32
      %12 = vector.broadcast %cst_10 : f32 to vector<16x128xf32>
      %c0_11 = arith.constant 0 : index
      %c0_12 = arith.constant 0 : index
      %13 = vector.load %arg10[%c0_11, %c0_12] : memref<16x128xf32, #tpu.memory_space<vmem>>, vector<16x128xf32>
      tpu.vector_store %arg10[%c0_11, %c0_12], %12 {strides = array<i32>} : memref<16x128xf32, #tpu.memory_space<vmem>>, vector<16x128xf32>,
    } else {
    }
    %c0 = arith.constant 0 : index
    %c0_1 = arith.constant 0 : index
    %3 = vector.load %arg10[%c0, %c0_1] : memref<16x128xf32, #tpu.memory_space<vmem>>, vector<16x128xf32>
    %c0_2 = arith.constant 0 : index
    %c0_3 = arith.constant 0 : index
    %4 = vector.load %arg2[%c0_2, %c0_3] : memref<16x768xbf16, #tpu.memory_space<vmem>>, vector<16x768xbf16>
    %c0_4 = arith.constant 0 : index
    %c0_5 = arith.constant 0 : index
    %5 = vector.load %arg3[%c0_4, %c0_5] : memref<768x128xbf16, #tpu.memory_space<vmem>>, vector<768x128xbf16>
    %cst = arith.constant dense<0.000000e+00> : vector<16x128xf32>
    %6 = tpu.matmul %4, %5, %cst {dimension_numbers = #tpu.dot_dimension_numbers<[1], [0], [0], [1], [0, 0, 1, 1], [], []>} : vector<16x768xbf16>, vector<768x128xbf16>, vector<16x128xf32> -> vector<16x128xf32>
    %7 = arith.addf %3, %6 : vector<16x128xf32>
    %c0_6 = arith.constant 0 : index
    %c0_7 = arith.constant 0 : index
    %8 = vector.load %arg10[%c0_6, %c0_7] : memref<16x128xf32, #tpu.memory_space<vmem>>, vector<16x128xf32>
    tpu.vector_store %arg10[%c0_6, %c0_7], %7 {strides = array<i32>} : memref<16x128xf32, #tpu.memory_space<vmem>>, vector<16x128xf32>,
    %c0_i32_8 = arith.constant 0 : i32
    %9 = arith.cmpi eq, %arg1, %c0_i32_8 : i32
    %10 = arith.extui %9 : i1 to i32
    %c0_i32_9 = arith.constant 0 : i32
    %11 = arith.cmpi ne, %10, %c0_i32_9 : i32
    scf.if %11 {
      %c0_10 = arith.constant 0 : index
      %c0_11 = arith.constant 0 : index
      %12 = vector.load %arg10[%c0_10, %c0_11] : memref<16x128xf32, #tpu.memory_space<vmem>>, vector<16x128xf32>
      %c0_12 = arith.constant 0 : index
      %c0_13 = arith.constant 0 : index
      %13 = vector.load %arg4[%c0_12, %c0_13] : memref<1x128xf32, #tpu.memory_space<vmem>>, vector<1x128xf32>
      %14 = vector.broadcast %13 : vector<1x128xf32> to vector<16x128xf32>
      %15 = arith.addf %12, %14 : vector<16x128xf32>
      %cst_14 = arith.constant 0.000000e+00 : f32
      %16 = vector.broadcast %cst_14 : f32 to vector<16x128xf32>
      %17 = arith.maximumf %15, %16 : vector<16x128xf32>
      %18 = arith.truncf %17 : vector<16x128xf32> to vector<16x128xbf16>
      %c0_15 = arith.constant 0 : index
      %c0_16 = arith.constant 0 : index
      %c0_17 = arith.constant 0 : index
      %19 = vector.load %arg5[%c0_15, %c0_16, %c0_17] : memref<3x128x128xbf16, #tpu.memory_space<vmem>>, vector<1x128x128xbf16>
      %20 = vector.shape_cast %19 : vector<1x128x128xbf16> to vector<128x128xbf16>
      %cst_18 = arith.constant dense<0.000000e+00> : vector<16x128xf32>
      %21 = tpu.matmul %18, %20, %cst_18 {dimension_numbers = #tpu.dot_dimension_numbers<[1], [0], [0], [1], [0, 0, 1, 1], [], []>} : vector<16x128xbf16>, vector<128x128xbf16>, vector<16x128xf32> -> vector<16x128xf32>
      %c0_19 = arith.constant 0 : index
      %c0_20 = arith.constant 0 : index
      %c0_21 = arith.constant 0 : index
      %22 = vector.load %arg6[%c0_19, %c0_20, %c0_21] : memref<3x1x128xf32, #tpu.memory_space<vmem>>, vector<1x1x128xf32>
      %23 = vector.shape_cast %22 : vector<1x1x128xf32> to vector<1x128xf32>
      %24 = vector.broadcast %23 : vector<1x128xf32> to vector<16x128xf32>
      %25 = arith.addf %21, %24 : vector<16x128xf32>
      %26 = arith.addf %25, %17 : vector<16x128xf32>
      %cst_22 = arith.constant 0.000000e+00 : f32
      %27 = vector.broadcast %cst_22 : f32 to vector<16x128xf32>
      %28 = arith.maximumf %26, %27 : vector<16x128xf32>
      %29 = arith.truncf %28 : vector<16x128xf32> to vector<16x128xbf16>
      %c1 = arith.constant 1 : index
      %c0_23 = arith.constant 0 : index
      %c0_24 = arith.constant 0 : index
      %30 = vector.load %arg5[%c1, %c0_23, %c0_24] : memref<3x128x128xbf16, #tpu.memory_space<vmem>>, vector<1x128x128xbf16>
      %31 = vector.shape_cast %30 : vector<1x128x128xbf16> to vector<128x128xbf16>
      %cst_25 = arith.constant dense<0.000000e+00> : vector<16x128xf32>
      %32 = tpu.matmul %29, %31, %cst_25 {dimension_numbers = #tpu.dot_dimension_numbers<[1], [0], [0], [1], [0, 0, 1, 1], [], []>} : vector<16x128xbf16>, vector<128x128xbf16>, vector<16x128xf32> -> vector<16x128xf32>
      %c1_26 = arith.constant 1 : index
      %c0_27 = arith.constant 0 : index
      %c0_28 = arith.constant 0 : index
      %33 = vector.load %arg6[%c1_26, %c0_27, %c0_28] : memref<3x1x128xf32, #tpu.memory_space<vmem>>, vector<1x1x128xf32>
      %34 = vector.shape_cast %33 : vector<1x1x128xf32> to vector<1x128xf32>
      %35 = vector.broadcast %34 : vector<1x128xf32> to vector<16x128xf32>
      %36 = arith.addf %32, %35 : vector<16x128xf32>
      %37 = arith.addf %36, %28 : vector<16x128xf32>
      %cst_29 = arith.constant 0.000000e+00 : f32
      %38 = vector.broadcast %cst_29 : f32 to vector<16x128xf32>
      %39 = arith.maximumf %37, %38 : vector<16x128xf32>
      %40 = arith.truncf %39 : vector<16x128xf32> to vector<16x128xbf16>
      %c2 = arith.constant 2 : index
      %c0_30 = arith.constant 0 : index
      %c0_31 = arith.constant 0 : index
      %41 = vector.load %arg5[%c2, %c0_30, %c0_31] : memref<3x128x128xbf16, #tpu.memory_space<vmem>>, vector<1x128x128xbf16>
      %42 = vector.shape_cast %41 : vector<1x128x128xbf16> to vector<128x128xbf16>
      %cst_32 = arith.constant dense<0.000000e+00> : vector<16x128xf32>
      %43 = tpu.matmul %40, %42, %cst_32 {dimension_numbers = #tpu.dot_dimension_numbers<[1], [0], [0], [1], [0, 0, 1, 1], [], []>} : vector<16x128xbf16>, vector<128x128xbf16>, vector<16x128xf32> -> vector<16x128xf32>
      %c2_33 = arith.constant 2 : index
      %c0_34 = arith.constant 0 : index
      %c0_35 = arith.constant 0 : index
      %44 = vector.load %arg6[%c2_33, %c0_34, %c0_35] : memref<3x1x128xf32, #tpu.memory_space<vmem>>, vector<1x1x128xf32>
      %45 = vector.shape_cast %44 : vector<1x1x128xf32> to vector<1x128xf32>
      %46 = vector.broadcast %45 : vector<1x128xf32> to vector<16x128xf32>
      %47 = arith.addf %43, %46 : vector<16x128xf32>
      %48 = arith.addf %47, %39 : vector<16x128xf32>
      %cst_36 = arith.constant 0.000000e+00 : f32
      %49 = vector.broadcast %cst_36 : f32 to vector<16x128xf32>
      %50 = arith.maximumf %48, %49 : vector<16x128xf32>
      %51 = arith.truncf %50 : vector<16x128xf32> to vector<16x128xbf16>
      %c0_37 = arith.constant 0 : index
      %c0_38 = arith.constant 0 : index
      %52 = vector.load %arg7[%c0_37, %c0_38] : memref<128x128xbf16, #tpu.memory_space<vmem>>, vector<128x128xbf16>
      %cst_39 = arith.constant dense<0.000000e+00> : vector<16x128xf32>
      %53 = tpu.matmul %51, %52, %cst_39 {dimension_numbers = #tpu.dot_dimension_numbers<[1], [0], [0], [1], [0, 0, 1, 1], [], []>} : vector<16x128xbf16>, vector<128x128xbf16>, vector<16x128xf32> -> vector<16x128xf32>
      %c0_40 = arith.constant 0 : index
      %c0_41 = arith.constant 0 : index
      %54 = vector.load %arg8[%c0_40, %c0_41] : memref<1x128xf32, #tpu.memory_space<vmem>>, vector<1x128xf32>
      %55 = vector.broadcast %54 : vector<1x128xf32> to vector<16x128xf32>
      %56 = arith.addf %53, %55 : vector<16x128xf32>
      %c0_42 = arith.constant 0 : index
      %c0_43 = arith.constant 0 : index
      %57 = vector.load %arg9[%c0_42, %c0_43] : memref<16x128xf32, #tpu.memory_space<vmem>>, vector<16x128xf32>
      tpu.vector_store %arg9[%c0_42, %c0_43], %56 {strides = array<i32>} : memref<16x128xf32, #tpu.memory_space<vmem>>, vector<16x128xf32>,
    } else {
    }
    return
  }
  func.func @transform_0(%arg0: i32, %arg1: i32) -> (i32, i32) {
    %c0_i32 = arith.constant 0 : i32
    return %arg0, %arg1 : i32, i32
  }
  func.func @transform_1(%arg0: i32, %arg1: i32) -> (i32, i32) {
    %c0_i32 = arith.constant 0 : i32
    %c0_i32_0 = arith.constant 0 : i32
    return %arg1, %c0_i32 : i32, i32
  }
  func.func @transform_2(%arg0: i32, %arg1: i32) -> (i32, i32) {
    %c0_i32 = arith.constant 0 : i32
    %c0_i32_0 = arith.constant 0 : i32
    %c0_i32_1 = arith.constant 0 : i32
    return %c0_i32, %c0_i32_0 : i32, i32
  }
  func.func @transform_3(%arg0: i32, %arg1: i32) -> (i32, i32, i32) {
    %c0_i32 = arith.constant 0 : i32
    %c0_i32_0 = arith.constant 0 : i32
    %c0_i32_1 = arith.constant 0 : i32
    %c0_i32_2 = arith.constant 0 : i32
    return %c0_i32, %c0_i32_0, %c0_i32_1 : i32, i32, i32
  }
  func.func @transform_4(%arg0: i32, %arg1: i32) -> (i32, i32, i32) {
    %c0_i32 = arith.constant 0 : i32
    %c0_i32_0 = arith.constant 0 : i32
    %c0_i32_1 = arith.constant 0 : i32
    %c0_i32_2 = arith.constant 0 : i32
    return %c0_i32, %c0_i32_0, %c0_i32_1 : i32, i32, i32
  }
  func.func @transform_5(%arg0: i32, %arg1: i32) -> (i32, i32) {
    %c0_i32 = arith.constant 0 : i32
    %c0_i32_0 = arith.constant 0 : i32
    %c0_i32_1 = arith.constant 0 : i32
    return %c0_i32, %c0_i32_0 : i32, i32
  }
  func.func @transform_6(%arg0: i32, %arg1: i32) -> (i32, i32) {
    %c0_i32 = arith.constant 0 : i32
    %c0_i32_0 = arith.constant 0 : i32
    %c0_i32_1 = arith.constant 0 : i32
    return %c0_i32, %c0_i32_0 : i32, i32
  }
  func.func @transform_7(%arg0: i32, %arg1: i32) -> (i32, i32) {
    %c0_i32 = arith.constant 0 : i32
    %c0_i32_0 = arith.constant 0 : i32
    return %arg0, %c0_i32 : i32, i32
  }
}

</mosaic_0001>

<bundles_post_ra>
// kernel: tpu_custom_call.1
= control target key start
LH: loop header
LB: loop body
LE: loop exit
PB: predicated region body
PF: predicated region fallthrough
CT: control target
= control target key end

     0   :  { %12 = vsyncpa [#allocation4], 0  ;;  %s1695_s0 = inlined_call_operand.hbm [shape: bf16[16,768], index: 0, kind: input, shape index: {}]   ;;  %s1696_s1 = inlined_call_operand.hbm [shape: bf16[768,128], index: 1, kind: input, shape index: {}]   ;;  %s1697_s2 = inlined_call_operand.hbm [shape: f32[1,128], index: 2, kind: input, shape index: {}]   ;;  %s1698_s3 = inlined_call_operand.hbm [shape: bf16[3,128,128], index: 3, kind: input, shape index: {}]   ;;  %s1699_s4 = inlined_call_operand.vmem [shape: f32[3,1,128], index: 4, kind: input, shape index: {}]   ;;  %s1700_s5 = inlined_call_operand.hbm [shape: bf16[128,128], index: 5, kind: input, shape index: {}]   ;;  %s1701_s6 = inlined_call_operand.vmem [shape: f32[1,128], index: 6, kind: input, shape index: {}]   ;;  %s1702_s7 = inlined_call_operand.hbm [shape: f32[16,128], index: 7, kind: output, shape index: {}]  }
   0x1   :  { %13 = vsyncpa [#allocation7], 0 }
   0x2   :  { %14 = vsyncpa [#allocation10], 0  ;;  %s33_s26 = sshll.u32 %s1696_s1, 4  ;;  %s34_s26 = int_to_ptr.hbm [resolvable:$true] %s33_s26 }
   0x3   :  { %15 = vsyncpa [#allocation5], 0  ;;  %s1604_s27 = smov [#allocation6]   ;;  %s57_s8 = sshll.u32 %s1698_s3, 4  ;;  %s58_s8 = int_to_ptr.hbm [resolvable:$true] %s57_s8 }
   0x4   :  { %s35_s28 = sshll.u32 %s1604_s27, 4  ;;  %s1605_s9 = smov 64   ;;  %s36_s28 = int_to_ptr.vmem [resolvable:$true] %s35_s28 }
   0x5   :  { %s1606_s10 = smov 4   ;;  %s1607_s11 = smov [#allocation9]  }
   0x6   :  { %41 = dma.hbm_to_vmem [thread:$0]  %s34_s26, 6144, %s36_s28, [#allocation7], %s1605_s9, %s1605_s9, %s1606_s10  }
   0x7   :  { %s59_s12 = sshll.u32 %s1607_s11, 4  ;;  %s20_s14 = sshll.u32 %s1695_s0, 4  ;;  %s60_s12 = int_to_ptr.vmem [resolvable:$true] %s59_s12  ;;  %s21_s14 = int_to_ptr.hbm [resolvable:$true] %s20_s14 }
   0x8   :  { %65 = dma.hbm_to_vmem [thread:$0]  %s58_s8, 3072, %s60_s12, [#allocation10], %s1605_s9, %s1605_s9, %s1606_s10  }
   0x9   :  { %s1608_s3 = smov [#allocation3]   ;;  %s47_s18 = sshll.u32 %s1697_s2, 4  ;;  %s48_s18 = int_to_ptr.hbm [resolvable:$true] %s47_s18 }
   0xa   :  { %s22_s15 = sshll.u32 %s1608_s3, 4  ;;  %s1609_s19 = smov 384   ;;  %s23_s15 = int_to_ptr.vmem [resolvable:$true] %s22_s15 }
   0xb   :  { %s1610_s20 = smov 24   ;;  %s1611_s21 = smov [#allocation8]  }
   0xc   :  { %28 = dma.hbm_to_vmem [thread:$0]  %s21_s14, 768, %s23_s15, [#allocation4], %s1609_s19, %s1609_s19, %s1610_s20  }
   0xd   :  { %s49_s22 = sshll.u32 %s1611_s21, 4  ;;  %s72_s24 = sshll.u32 %s1700_s5, 4  ;;  %s50_s22 = int_to_ptr.vmem [resolvable:$true] %s49_s22  ;;  %s73_s24 = int_to_ptr.hbm [resolvable:$true] %s72_s24 }
   0xe   :  { %52 = dma.hbm_to_vmem [thread:$0]  %s48_s18, 16, %s50_s22, [#allocation7]  }
   0xf   :  { %s1612_s25 = smov [#allocation11]  }
  0x10   :  { %s74_s26 = sshll.u32 %s1612_s25, 4  ;;  %s75_s26 = int_to_ptr.vmem [resolvable:$true] %s74_s26 }
  0x11   :  { %80 = dma.hbm_to_vmem [thread:$0]  %s73_s24, 1024, %s75_s26, [#allocation10], %s1605_s9, %s1605_s9, %s1606_s10  }
  0x12   :  { %1596 = dma.done.wait [#allocation4], 768  }
  0x13   :  { %1597 = vsyncadd [#allocation4], 4294966528 }
  0x14   :  { %1598 = dma.done.wait [#allocation7], 6160  }
  0x15   :  { %1599 = vsyncadd [#allocation7], 4294961136 }
  0x16   :  { %1600 = dma.done.wait [#allocation10], 4096  }
  0x17   :  { %1601 = vsyncadd [#allocation10], 4294963200  ;;  %v1362_v0 = vld [vmem:[#allocation6 + $0x38] sm:$0xff]  ;;  %v1361_v4 = vld [vmem:[#allocation6 + $0x30] sm:$0xff]  ;;  %s1613_s10 = smov [#allocation12]   ;;  %s988_s13 = sshll.u32 %s1702_s7, 4  ;;  %s989_s13 = int_to_ptr.hbm [resolvable:$true] %s988_s13 }
  0x18   :  { %v1370_v1 = vld [vmem:[#allocation6 + $0x78] sm:$0xff]  ;;  %531 = vmatpush.bf16.msra.mxu0 %v1362_v0  ;;  %v1369_v5 = vld [vmem:[#allocation6 + $0x70] sm:$0xff]  ;;  %v1360_v8 = vld [vmem:[#allocation6 + $0x28] sm:$0xff]  ;;  %s986_s11 = sshll.u32 %s1613_s10, 4  ;;  %s1614_s1 = smov 128   ;;  %s987_s11 = int_to_ptr.vmem [resolvable:$true] %s986_s11 }
  0x19   :  { %v1378_v2 = vld [vmem:[#allocation6 + $0xb8] sm:$0xff]  ;;  %545 = vmatpush.bf16.msra.mxu1 %v1370_v1  ;;  %v1377_v6 = vld [vmem:[#allocation6 + $0xb0] sm:$0xff]  ;;  %v1368_v9 = vld [vmem:[#allocation6 + $0x68] sm:$0xff]  ;;  %s1615_s14 = smov 8  }
  0x1a   :  { %v1386_v3 = vld [vmem:[#allocation6 + $0xf8] sm:$0xff]  ;;  %559 = vmatpush.bf16.msra.mxu2 %v1378_v2  ;;  %v1385_v7 = vld [vmem:[#allocation6 + $0xf0] sm:$0xff]  ;;  %v1376_v10 = vld [vmem:[#allocation6 + $0xa8] sm:$0xff] }
  0x1b   :  { %573 = vmatpush.bf16.msra.mxu3 %v1386_v3  ;;  %v1384_v11 = vld [vmem:[#allocation6 + $0xe8] sm:$0xff]  ;;  %v1359_v12 = vld [vmem:[#allocation6 + $0x20] sm:$0xff]  ;;  %v1358_v16 = vld [vmem:[#allocation6 + $0x18] sm:$0xff] }
  0x1c   :  { %532 = vmatpush.bf16.msra.mxu0 %v1361_v4  ;;  %v1367_v13 = vld [vmem:[#allocation6 + $0x60] sm:$0xff]  ;;  %v1366_v17 = vld [vmem:[#allocation6 + $0x58] sm:$0xff]  ;;  %v1357_v20 = vld [vmem:[#allocation6 + $0x10] sm:$0xff] }
  0x1d   :  { %546 = vmatpush.bf16.msra.mxu1 %v1369_v5  ;;  %v1375_v14 = vld [vmem:[#allocation6 + $0xa0] sm:$0xff]  ;;  %v1374_v18 = vld [vmem:[#allocation6 + $0x98] sm:$0xff]  ;;  %v1365_v21 = vld [vmem:[#allocation6 + $0x50] sm:$0xff] }
  0x1e   :  { %560 = vmatpush.bf16.msra.mxu2 %v1377_v6  ;;  %v1383_v15 = vld [vmem:[#allocation6 + $0xe0] sm:$0xff]  ;;  %v1382_v19 = vld [vmem:[#allocation6 + $0xd8] sm:$0xff]  ;;  %v1373_v22 = vld [vmem:[#allocation6 + $0x90] sm:$0xff] }
  0x1f   :  { %574 = vmatpush.bf16.msra.mxu3 %v1385_v7  ;;  %v1381_v23 = vld [vmem:[#allocation6 + $0xd0] sm:$0xff]  ;;  %v1356_v24 = vld [vmem:[#allocation6 + $0x8] sm:$0xff]  ;;  %v1355_v28 = vld [vmem:[#allocation6] sm:$0xff] }
  0x20   :  { %533 = vmatpush.bf16.msra.mxu0 %v1360_v8  ;;  %v1364_v25 = vld [vmem:[#allocation6 + $0x48] sm:$0xff]  ;;  %v1363_v29 = vld [vmem:[#allocation6 + $0x40] sm:$0xff]  ;;  %v1394_v31 = vld [vmem:[#allocation6 + $0x138] sm:$0xff] }
  0x21   :  { %547 = vmatpush.bf16.msra.mxu1 %v1368_v9  ;;  %v1372_v26 = vld [vmem:[#allocation6 + $0x88] sm:$0xff]  ;;  %v1371_v30 = vld [vmem:[#allocation6 + $0x80] sm:$0xff]  ;;  %v1005_v32 = vld [vmem:[#allocation3] sm:$0xf] }
  0x22   :  { %561 = vmatpush.bf16.msra.mxu2 %v1376_v10  ;;  %v1380_v27 = vld [vmem:[#allocation6 + $0xc8] sm:$0xff]  ;;  %v1349_v34 = vld [vmem:[#allocation3 + $0x4] sm:$0xf]  ;;  %v1402_v36 = vld [vmem:[#allocation6 + $0x178] sm:$0xff] }
  0x23   :  { %575 = vmatpush.bf16.msra.mxu3 %v1384_v11  ;;  %v1352_v33 = vld [vmem:[#allocation3 + $0x14] sm:$0xf0]  ;;  %v1007_v35 = vld [vmem:[#allocation3 + $0x18] sm:$0xf0]  ;;  %v1013_v37 = vld [vmem:[#allocation3 + $0x8] sm:$0xf] }
  0x24   :  { %534 = vmatpush.bf16.msra.mxu0 %v1359_v12  ;;  %v1353_v38 = vld [vmem:[#allocation3 + $0x1c] sm:$0xf0]  ;;  %v1379_v39 = vld [vmem:[#allocation6 + $0xc0] sm:$0xff]  ;;  %v1350_v40 = vld [vmem:[#allocation3 + $0xc] sm:$0xf]  ;;  %v1006_v42 = vor.u32 %v1352_v33, %v1005_v32  ;;  %v1010_v43 = vor.u32 %v1349_v34, %v1007_v35 }
  0x25   :  { %548 = vmatpush.bf16.msra.mxu1 %v1367_v13  ;;  %v1015_v41 = vld [vmem:[#allocation3 + $0x20] sm:$0xf0]  ;;  %v1014_v44 = vor.u32 %v1353_v38, %v1013_v37  ;;  %v1392_v48 = vld [vmem:[#allocation6 + $0x128] sm:$0xff]  ;;  %v1391_v50 = vld [vmem:[#allocation6 + $0x120] sm:$0xff] }
  0x26   :  { %562 = vmatpush.bf16.msra.mxu2 %v1375_v14  ;;  %v1393_v45 = vld [vmem:[#allocation6 + $0x130] sm:$0xff]  ;;  %v1018_v46 = vor.u32 %v1350_v40, %v1015_v41  ;;  %v1400_v49 = vld [vmem:[#allocation6 + $0x168] sm:$0xff]  ;;  %v1399_v51 = vld [vmem:[#allocation6 + $0x160] sm:$0xff] }
  0x27   :  { %576 = vmatpush.bf16.msra.mxu3 %v1383_v15  ;;  %v1401_v47 = vld [vmem:[#allocation6 + $0x170] sm:$0xff]  ;;  %v1390_v52 = vld [vmem:[#allocation6 + $0x118] sm:$0xff]  ;;  %v1388_v56 = vld [vmem:[#allocation6 + $0x108] sm:$0xff] }
  0x28   :  { %535 = vmatpush.bf16.msra.mxu0 %v1358_v16  ;;  %v1398_v53 = vld [vmem:[#allocation6 + $0x158] sm:$0xff]  ;;  %v1389_v54 = vld [vmem:[#allocation6 + $0x110] sm:$0xff]  ;;  %v1396_v57 = vld [vmem:[#allocation6 + $0x148] sm:$0xff] }
  0x29   :  { %549 = vmatpush.bf16.msra.mxu1 %v1366_v17  ;;  %v1397_v55 = vld [vmem:[#allocation6 + $0x150] sm:$0xff]  ;;  %v1387_v58 = vld [vmem:[#allocation6 + $0x100] sm:$0xff]  ;;  %v1354_v60 = vld [vmem:[#allocation3 + $0x24] sm:$0xf0] }
  0x2a   :  { %563 = vmatpush.bf16.msra.mxu2 %v1374_v18  ;;  %v1021_v59 = vld [vmem:[#allocation3 + $0x10] sm:$0xf]  ;;  %v1351_v62 = vld [vmem:[#allocation3 + $0x14] sm:$0xf]  ;;  %v1023_v63 = vld [vmem:[#allocation3 + $0x28] sm:$0xf0] }
  0x2b   :  { %577 = vmatpush.bf16.msra.mxu3 %v1382_v19  ;;  %v1395_v61 = vld [vmem:[#allocation6 + $0x140] sm:$0xff]  ;;  %v1022_v0 = vor.u32 %v1354_v60, %v1021_v59  ;;  %v1026_v1 = vor.u32 %v1351_v62, %v1023_v63  ;;  %v1409_v3 = vld [vmem:[#allocation9 + $0x30] sm:$0xff]  ;;  %v1408_v4 = vld [vmem:[#allocation9 + $0x28] sm:$0xff] }
  0x2c   :  { %536 = vmatpush.bf16.msra.mxu0 %v1357_v20  ;;  %v1410_v2 = vld [vmem:[#allocation9 + $0x38] sm:$0xff]  ;;  %v1407_v5 = vld [vmem:[#allocation9 + $0x20] sm:$0xff]  ;;  %v1405_v7 = vld [vmem:[#allocation9 + $0x10] sm:$0xff] }
  0x2d   :  { %550 = vmatpush.bf16.msra.mxu1 %v1365_v21  ;;  %v1406_v6 = vld [vmem:[#allocation9 + $0x18] sm:$0xff]  ;;  %v1404_v8 = vld [vmem:[#allocation9 + $0x8] sm:$0xff]  ;;  %v1403_v11 = vld [vmem:[#allocation9] sm:$0xff] }
  0x2e   :  { %564 = vmatpush.bf16.msra.mxu2 %v1373_v22  ;;  %v1418_v12 = vld [vmem:[#allocation9 + $0x78] sm:$0xff]  ;;  %v1417_v13 = vld [vmem:[#allocation9 + $0x70] sm:$0xff]  ;;  %v1416_v18 = vld [vmem:[#allocation9 + $0x68] sm:$0xff] }
  0x2f   :  { %578 = vmatpush.bf16.msra.mxu3 %v1381_v23  ;;  %v1415_v21 = vld [vmem:[#allocation9 + $0x60] sm:$0xff]  ;;  %v1447_v32 = vld [vmem:[#allocation8] ss:$0 sm:$0xff]  ;;  %v1420_v62 = vld [vmem:[#allocation9 + $0x88] sm:$0xff] }
  0x30   :  { %537 = vmatpush.bf16.msra.mxu0 %v1356_v24  ;;  %v1422_v60 = vld [vmem:[#allocation9 + $0x98] sm:$0xff]  ;;  %v1419_v63 = vld [vmem:[#allocation9 + $0x80] sm:$0xff] }
  0x31   :  { %551 = vmatpush.bf16.msra.mxu1 %v1364_v25 }
  0x32   :  { %565 = vmatpush.bf16.msra.mxu2 %v1372_v26 }
  0x33   :  { %579 = vmatpush.bf16.msra.mxu3 %v1380_v27 }
  0x34   :  { %538 = vmatpush.bf16.msra.mxu0 %v1355_v28 }
  0x35   :  { %552 = vmatpush.bf16.msra.mxu1 %v1363_v29 }
  0x36   :  { %566 = vmatpush.bf16.msra.mxu2 %v1371_v30 }
  0x37   :  { %580 = vmatpush.bf16.msra.mxu3 %v1379_v39  ;;  %539 = vmatmul.bf16.vlgmr.msra.gmra.mxu0 %v1006_v42  ;;  %v1414_v42 = vld [vmem:[#allocation9 + $0x58] sm:$0xff] }
  0x38   :  { %587 = vmatpush.bf16.msrb.mxu0 %v1394_v31  ;;  %553 = vmatmul.bf16.vlgmr.msra.gmra.mxu1 %v1010_v43  ;;  %v1413_v43 = vld [vmem:[#allocation9 + $0x50] sm:$0xff] }
  0x39   :  { %601 = vmatpush.bf16.msrb.mxu1 %v1402_v36  ;;  %567 = vmatmul.bf16.vlgmr.msra.gmra.mxu2 %v1014_v44  ;;  %v1412_v44 = vld [vmem:[#allocation9 + $0x48] sm:$0xff] }
  0x3a   :  { %581 = vmatmul.bf16.vlgmr.msra.gmra.mxu3 %v1018_v46  ;;  %701 = vmatpush.bf16.msrb.mxu2 %v1410_v2  ;;  %v1426_v46 = vld [vmem:[#allocation9 + $0xb8] sm:$0xff]  ;;  %v1432_v2 = vld [vmem:[#allocation11 + $0x28] sm:$0xff] }
  0x3b   :  { %790 = vmatpush.bf16.msrb.mxu3 %v1418_v12 }
  0x3c   :  { %588 = vmatpush.bf16.msrb.mxu0 %v1393_v45  ;;  %v1411_v45 = vld [vmem:[#allocation9 + $0x40] sm:$0xff] }
  0x3d   :  { %602 = vmatpush.bf16.msrb.mxu1 %v1401_v47  ;;  %v1425_v47 = vld [vmem:[#allocation9 + $0xb0] sm:$0xff] }
  0x3e   :  { %702 = vmatpush.bf16.msrb.mxu2 %v1409_v3  ;;  %v1431_v3 = vld [vmem:[#allocation11 + $0x20] sm:$0xff] }
  0x3f   :  { %791 = vmatpush.bf16.msrb.mxu3 %v1417_v13 }
  0x40   :  { %589 = vmatpush.bf16.msrb.mxu0 %v1392_v48  ;;  %v1424_v48 = vld [vmem:[#allocation9 + $0xa8] sm:$0xff] }
  0x41   :  { %603 = vmatpush.bf16.msrb.mxu1 %v1400_v49  ;;  %v1423_v49 = vld [vmem:[#allocation9 + $0xa0] sm:$0xff] }
  0x42   :  { %703 = vmatpush.bf16.msrb.mxu2 %v1408_v4 }
  0x43   :  { %792 = vmatpush.bf16.msrb.mxu3 %v1416_v18 }
  0x44   :  { %590 = vmatpush.bf16.msrb.mxu0 %v1391_v50 }
  0x45   :  { %604 = vmatpush.bf16.msrb.mxu1 %v1399_v51  ;;  %v1448_v51 = vld [vmem:[%s1699_s4] ss:$0 sm:$0xff] }
  0x46   :  { %704 = vmatpush.bf16.msrb.mxu2 %v1407_v5  ;;  %v1449_v5 = vld [vmem:[%s1699_s4 + $0x1] ss:$0 sm:$0xff] }
  0x47   :  { %793 = vmatpush.bf16.msrb.mxu3 %v1415_v21 }
  0x48   :  { %591 = vmatpush.bf16.msrb.mxu0 %v1390_v52 }
  0x49   :  { %605 = vmatpush.bf16.msrb.mxu1 %v1398_v53 }
  0x4a   :  { %705 = vmatpush.bf16.msrb.mxu2 %v1406_v6 }
  0x4b   :  { %794 = vmatpush.bf16.msrb.mxu3 %v1414_v42 }
  0x4c   :  { %592 = vmatpush.bf16.msrb.mxu0 %v1389_v54 }
  0x4d   :  { %606 = vmatpush.bf16.msrb.mxu1 %v1397_v55 }
  0x4e   :  { %706 = vmatpush.bf16.msrb.mxu2 %v1405_v7 }
  0x4f   :  { %795 = vmatpush.bf16.msrb.mxu3 %v1413_v43 }
  0x50   :  { %593 = vmatpush.bf16.msrb.mxu0 %v1388_v56 }
  0x51   :  { %607 = vmatpush.bf16.msrb.mxu1 %v1396_v57 }
  0x52   :  { %707 = vmatpush.bf16.msrb.mxu2 %v1404_v8 }
  0x53   :  { %796 = vmatpush.bf16.msrb.mxu3 %v1412_v44 }
  0x54   :  { %594 = vmatpush.bf16.msrb.mxu0 %v1387_v58 }
  0x55   :  { %608 = vmatpush.bf16.msrb.mxu1 %v1395_v61  ;;  %v1421_v61 = vld [vmem:[#allocation9 + $0x90] sm:$0xff] }
  0x56   :  { %708 = vmatpush.bf16.msrb.mxu2 %v1403_v11 }
  0x57   :  { %595 = vmatmul.bf16.vlgmr.msrb.gmra.mxu0 %v1022_v0  ;;  %797 = vmatpush.bf16.msrb.mxu3 %v1411_v45  ;;  %v1434_v0 = vld [vmem:[#allocation11 + $0x38] sm:$0xff] }
  0x58   :  { %609 = vmatmul.bf16.vlgmr.msrb.gmra.mxu1 %v1026_v1  ;;  %879 = vmatpush.bf16.msra.mxu0 %v1426_v46  ;;  %v1433_v1 = vld [vmem:[#allocation11 + $0x30] sm:$0xff] }
  0x59   :  { %966 = vmatpush.bf16.msra.mxu1 %v1434_v0 }
  0x5c   :  { %880 = vmatpush.bf16.msra.mxu0 %v1425_v47 }
  0x5d   :  { %967 = vmatpush.bf16.msra.mxu1 %v1433_v1 }
  0x60   :  { %881 = vmatpush.bf16.msra.mxu0 %v1424_v48 }
  0x61   :  { %968 = vmatpush.bf16.msra.mxu1 %v1432_v2 }
  0x64   :  { %882 = vmatpush.bf16.msra.mxu0 %v1423_v49 }
  0x65   :  { %969 = vmatpush.bf16.msra.mxu1 %v1431_v3 }
  0x68   :  { %883 = vmatpush.bf16.msra.mxu0 %v1422_v60 }
  0x6c   :  { %884 = vmatpush.bf16.msra.mxu0 %v1421_v61 }
  0x70   :  { %885 = vmatpush.bf16.msra.mxu0 %v1420_v62 }
  0x74   :  { %886 = vmatpush.bf16.msra.mxu0 %v1419_v63 }
  0xb4   :  { %v540_v9 = vpop.f32.mrf.mxu0 }
  0xb5   :  { %v554_v10 = vpop.f32.mrf.mxu1 }
  0xb6   :  { %v555_v16 = vadd.f32 %v554_v10, %v540_v9 }
  0xbc   :  { %v568_v14 = vpop.f32.mrf.mxu2  ;;  %v542_v15 = vpop.f32.mrf.mxu0 }
  0xbd   :  { %v556_v17 = vpop.f32.mrf.mxu1  ;;  %v582_v19 = vpop.f32.mrf.mxu3  ;;  %v569_v20 = vadd.f32 %v568_v14, %v555_v16  ;;  %v1430_v14 = vld [vmem:[#allocation11 + $0x18] sm:$0xff]  ;;  %v1428_v16 = vld [vmem:[#allocation11 + $0x8] sm:$0xff] }
  0xbe   :  { %v557_v22 = vadd.f32 %v556_v17, %v542_v15  ;;  %970 = vmatpush.bf16.msra.mxu1 %v1430_v14  ;;  %v1429_v15 = vld [vmem:[#allocation11 + $0x10] sm:$0xff]  ;;  %v1427_v17 = vld [vmem:[#allocation11] sm:$0xff] }
  0xbf   :  { %v583_v25 = vadd.f32 %v582_v19, %v569_v20  ;;  %v1450_v19 = vld [vmem:[%s1699_s4 + $0x2] ss:$0 sm:$0xff] }
  0xc2   :  { %971 = vmatpush.bf16.msra.mxu1 %v1429_v15 }
  0xc4   :  { %v570_v23 = vpop.f32.mrf.mxu2 }
  0xc5   :  { %v571_v27 = vadd.f32 %v570_v23, %v557_v22  ;;  %v584_v29 = vpop.f32.mrf.mxu3 }
  0xc6   :  { %972 = vmatpush.bf16.msra.mxu1 %v1428_v16 }
  0xc7   :  { %v585_v30 = vadd.f32 %v584_v29, %v571_v27 }
  0xca   :  { %973 = vmatpush.bf16.msra.mxu1 %v1427_v17 }
  0xd4   :  { %v596_v24 = vpop.f32.mrf.mxu0 }
  0xd5   :  { %v610_v26 = vpop.f32.mrf.mxu1  ;;  %v597_v28 = vadd.f32 %v596_v24, %v583_v25 }
  0xd7   :  { %v611_v31 = vadd.f32 %v610_v26, %v597_v28  ;;  %v1451_v28 = vld [vmem:[%s1701_s6] ss:$0 sm:$0xff] }
  0xd9   :  { %v628_v36 = vadd.f32 %v1447_v32, %v611_v31 }
  0xdb   :  { %v630_v39 = vmax.f32 %v628_v36, 0.0 }
  0xdc   :  { %v598_v33 = vpop.f32.mrf.mxu0 }
  0xdd   :  { %v599_v34 = vadd.f32 %v598_v33, %v585_v30  ;;  %v612_v35 = vpop.f32.mrf.mxu1 }
  0xdf   :  { %v613_v37 = vadd.f32 %v612_v35, %v599_v34 }
  0xe1   :  { %v629_v38 = vadd.f32 %v1447_v32, %v613_v37 }
  0xe3   :  { %v631_v40 = vmax.f32 %v629_v38, 0.0 }
  0xe5   :  { %v632_v41 = vpack.c.bf16 %v631_v40, %v630_v39 }
  0xe7   :  { %709 = vmatmul.bf16.vlgmr.msrb.gmra.mxu2 %v632_v41 }
 0x16a   :  { %v710_v50 = vpop.f32.mrf.mxu2 }
 0x16b   :  { %v711_v52 = vadd.f32 %v1448_v51, %v710_v50 }
 0x16d   :  { %v715_v54 = vadd.f32 %v711_v52, %v630_v39 }
 0x16f   :  { %v717_v57 = vmax.f32 %v715_v54, 0.0 }
 0x172   :  { %v712_v53 = vpop.f32.mrf.mxu2 }
 0x173   :  { %v713_v55 = vadd.f32 %v1448_v51, %v712_v53 }
 0x175   :  { %v716_v56 = vadd.f32 %v713_v55, %v631_v40 }
 0x177   :  { %v718_v58 = vmax.f32 %v716_v56, 0.0 }
 0x179   :  { %v719_v59 = vpack.c.bf16 %v718_v58, %v717_v57 }
 0x17b   :  { %798 = vmatmul.bf16.vlgmr.msrb.gmra.mxu3 %v719_v59 }
 0x1fe   :  { %v799_v4 = vpop.f32.mrf.mxu3 }
 0x1ff   :  { %v800_v6 = vadd.f32 %v1449_v5, %v799_v4 }
 0x201   :  { %v804_v8 = vadd.f32 %v800_v6, %v717_v57 }
 0x203   :  { %v806_v11 = vmax.f32 %v804_v8, 0.0 }
 0x206   :  { %v801_v7 = vpop.f32.mrf.mxu3 }
 0x207   :  { %v802_v9 = vadd.f32 %v1449_v5, %v801_v7 }
 0x209   :  { %v805_v10 = vadd.f32 %v802_v9, %v718_v58 }
 0x20b   :  { %v807_v12 = vmax.f32 %v805_v10, 0.0 }
 0x20d   :  { %v808_v13 = vpack.c.bf16 %v807_v12, %v806_v11 }
 0x20f   :  { %887 = vmatmul.bf16.vlgmr.msra.gmra.mxu0 %v808_v13 }
 0x28c   :  { %v888_v18 = vpop.f32.mrf.mxu0 }
 0x28d   :  { %v889_v20 = vadd.f32 %v1450_v19, %v888_v18 }
 0x28f   :  { %v893_v22 = vadd.f32 %v889_v20, %v806_v11 }
 0x291   :  { %v895_v25 = vmax.f32 %v893_v22, 0.0 }
 0x294   :  { %v890_v21 = vpop.f32.mrf.mxu0 }
 0x295   :  { %v891_v23 = vadd.f32 %v1450_v19, %v890_v21 }
 0x297   :  { %v894_v24 = vadd.f32 %v891_v23, %v807_v12 }
 0x299   :  { %v896_v26 = vmax.f32 %v894_v24, 0.0 }
 0x29b   :  { %v897_v27 = vpack.c.bf16 %v896_v26, %v895_v25 }
 0x29d   :  { %974 = vmatmul.bf16.vlgmr.msra.gmra.mxu1 %v897_v27 }
 0x31a   :  { %v975_v29 = vpop.f32.mrf.mxu1 }
 0x31b   :  { %v976_v30 = vadd.f32 %v1451_v28, %v975_v29 }
 0x31d   :  { %980 = vst [vmem:[#allocation12] sm:$0xff] %v976_v30 }
 0x322   :  { %v977_v31 = vpop.f32.mrf.mxu1 }
 0x323   :  { %v978_v32 = vadd.f32 %v1451_v28, %v977_v31 }
 0x325   :  { %981 = vst [vmem:[#allocation12 + $0x8] sm:$0xff] %v978_v32 }
 0x326   :  { %994 = dma.vmem_to_hbm [thread:$0]  %s987_s11, 256, %s989_s13, [#allocation5], %s1614_s1, %s1614_s1, %s1615_s14  }
 0x327   :  { %1602 = dma.done.wait [#allocation5], 256  }
 0x328   :  { %1603 = vsyncadd [#allocation5], 4294967040 }
 0x329   :  { %999 = vsyncpa [#allocation4], 1 }
 0x32a   :  { %1000 = vsyncpa [#allocation7], 1 }
 0x32b   :  { %1001 = vsyncpa [#allocation10], 1 }
 0x32c   :  { %1002 = vsyncpa [#allocation5], 1 }

</bundles_post_ra>
